<compile_context>
chip_gen: v7x
topology: tpu7x:2x2x1
jax: 0.10.0
libtpu: 0.0.40
codegen_flags: <defaults>
</compile_context>

<pallas_src>
import functools

import jax
import jax.numpy as jnp
from jax.experimental import pallas as pl
from jax.experimental.pallas import tpu as pltpu


def time_encoder_kernel(t_ref, w_ref, b_ref, o_ref):
    # t_ref: (TN, 1) f32, w_ref/b_ref: (1, OUT) f32, o_ref: (TN, OUT)
    t = t_ref[...]                      # (TN, 1)
    w = w_ref[...]                      # (1, OUT)
    b = b_ref[...]                      # (1, OUT)
    # Linear with in_features=1 == rank-1 broadcast FMA on the VPU (not MXU).
    y = t * w + b                       # (TN, OUT) f32
    o_ref[...] = jnp.maximum(y, 0.0).astype(o_ref.dtype)


def _pick_tile_n(n, out_dim, *, max_tile=2048, vmem_budget_bytes=12 * 1024 * 1024):
    """Choose a row-tile that is a multiple of 8, fits VMEM (double-buffered,
    safe for v7x's smaller VMEM and v5e's 16 MiB scoped default), and leaves
    >= 2 grid steps when N allows (so v7x can use both TensorCores)."""
    # Double-buffered bytes per row: out tile + t tile, f32.
    per_row = (out_dim + 1) * 4 * 2
    max_rows_by_vmem = max(8, vmem_budget_bytes // per_row)
    tile = min(max_tile, max_rows_by_vmem)
    # Keep at least 2 grid steps for megacore sharding when possible.
    tile = min(tile, max(8, pl.cdiv(n, 2)))
    # Round down to a multiple of 8 (sublane constraint).
    tile = max(8, (tile // 8) * 8)
    return tile


@functools.partial(jax.jit, static_argnames=("out_dim", "tile_n", "out_dtype"))
def _time_encoder_pallas(t, w2, b2, *, out_dim, tile_n, out_dtype):
    n = t.shape[0]
    grid_n = pl.cdiv(n, tile_n)         # ragged last block handled by Pallas masking
    return pl.pallas_call(
        time_encoder_kernel,
        out_shape=jax.ShapeDtypeStruct((n, out_dim), out_dtype),
        grid_spec=pltpu.PrefetchScalarGridSpec(
            num_scalar_prefetch=0,
            grid=(grid_n,),
            in_specs=[
                pl.BlockSpec((tile_n, 1), lambda i: (i, 0)),
                pl.BlockSpec((1, out_dim), lambda i: (0, 0)),
                pl.BlockSpec((1, out_dim), lambda i: (0, 0)),
            ],
            out_specs=pl.BlockSpec((tile_n, out_dim), lambda i: (i, 0)),
        ),
        compiler_params=pltpu.CompilerParams(
            dimension_semantics=("parallel",),
        ),
    )(t, w2, b2)


def time_encoder(time_data, weight, bias, *, tile_n=None, out_dtype=jnp.float32,
                 min_pallas_elems=1 << 20):
    """Pallas equivalent of: relu(nn.Linear(1, out_dim)(time_data.reshape(-1, 1))).

    weight: (out_dim, 1) as in nn.Linear(1, out_dim); bias: (out_dim,).
    out_dtype: keep f32 for exact module semantics; bf16 halves HBM store bytes.
    min_pallas_elems: below this N*out_dim, use fused XLA (kernel launch would
    dominate). Pass 0 to force the Pallas path.
    """
    t = time_data.astype(jnp.float32).reshape(-1, 1)          # (N, 1)
    n = t.shape[0]
    out_dim = weight.shape[0]

    w2 = weight.reshape(1, out_dim).astype(jnp.float32)        # == W.T, order-preserving
    b2 = bias.reshape(1, out_dim).astype(jnp.float32)

    # Tiny-problem fallback: fused XLA beats a pallas_call launch here.
    if n * out_dim < min_pallas_elems:
        return jnp.maximum(t * w2 + b2, 0.0).astype(out_dtype)

    # TODO(synk): if out_dim is ever not a multiple of 128, fold rows in the
    # wrapper to present a lane-dense (…,128) output slab instead of relying on
    # masked partial stores.
    if tile_n is None:
        tile_n = _pick_tile_n(n, out_dim)

    return _time_encoder_pallas(t, w2, b2, out_dim=out_dim, tile_n=int(tile_n),
                                out_dtype=out_dtype)


if __name__ == "__main__":
    key = jax.random.PRNGKey(0)
    k_t, k_w, k_b = jax.random.split(key, 3)

    out_dim = 128          # nn.Linear(1, out_dim)
    batch, seq = 2, 16     # time_data of shape (2, 16) -> flattened to (32, 1)

    time_data = jax.random.uniform(k_t, (batch, seq), dtype=jnp.float32) * 10.0
    # Deterministic synthetic params (nn.Linear(1, out_dim): weight (out_dim,1), bias (out_dim,))
    weight = jax.random.normal(k_w, (out_dim, 1), dtype=jnp.float32) * 0.5
    bias = jax.random.normal(k_b, (out_dim,), dtype=jnp.float32) * 0.1

    # Small case: force the Pallas path so the kernel itself is exercised.
    out = time_encoder(time_data, weight, bias, min_pallas_elems=0)
    out = jax.block_until_ready(out)

    t_flat = time_data.astype(jnp.float32).reshape(-1, 1)
    ref = jnp.maximum(t_flat @ weight.T + bias[None, :], 0.0)
    assert out.shape == (batch * seq, out_dim), out.shape
    assert jnp.allclose(out, ref, atol=1e-5, rtol=1e-5), "mismatch vs reference (small)"

    # Larger, non-multiple-of-tile N: exercises large tiles, the ragged last
    # block (masked edge stores), and the default dispatch threshold.
    n_big = 100_000
    td_big = jax.random.uniform(k_t, (n_big,), dtype=jnp.float32) * 10.0
    out_big = jax.block_until_ready(time_encoder(td_big, weight, bias))
    ref_big = jnp.maximum(td_big.reshape(-1, 1) @ weight.T + bias[None, :], 0.0)
    assert out_big.shape == (n_big, out_dim), out_big.shape
    assert jnp.allclose(out_big, ref_big, atol=1e-5, rtol=1e-5), "mismatch vs reference (big)"

    print("KERNEL_OK")
</pallas_src>

<mosaic_0001>
module attributes {stable_mosaic.version = 11 : i64} {
  func.func @time_encoder_kernel(%arg0: i32, %arg1: memref<16x1xf32, #tpu.memory_space<vmem>>, %arg2: memref<1x128xf32, #tpu.memory_space<vmem>>, %arg3: memref<1x128xf32, #tpu.memory_space<vmem>>, %arg4: memref<16x128xf32, #tpu.memory_space<vmem>>) attributes {dimension_semantics = [#tpu.dimension_semantics<parallel>], iteration_bounds = array<i64: 2>, scalar_prefetch = 0 : i64, scratch_operands = 0 : i64, tpu.core_type = #tpu.core_type<tc>, window_params = [{transform_indices = @transform_0, window_bounds = array<i64: 16, 1>}, {pipeline_mode = #tpu.pipeline_mode<synchronous>, transform_indices = @transform_1, window_bounds = array<i64: 1, 128>}, {pipeline_mode = #tpu.pipeline_mode<synchronous>, transform_indices = @transform_2, window_bounds = array<i64: 1, 128>}, {transform_indices = @transform_3, window_bounds = array<i64: 16, 128>}]} {
    %c0 = arith.constant 0 : index
    %c0_0 = arith.constant 0 : index
    %0 = vector.load %arg1[%c0, %c0_0] : memref<16x1xf32, #tpu.memory_space<vmem>>, vector<16x1xf32>
    %c0_1 = arith.constant 0 : index
    %c0_2 = arith.constant 0 : index
    %1 = vector.load %arg2[%c0_1, %c0_2] : memref<1x128xf32, #tpu.memory_space<vmem>>, vector<1x128xf32>
    %c0_3 = arith.constant 0 : index
    %c0_4 = arith.constant 0 : index
    %2 = vector.load %arg3[%c0_3, %c0_4] : memref<1x128xf32, #tpu.memory_space<vmem>>, vector<1x128xf32>
    %3 = vector.broadcast %0 : vector<16x1xf32> to vector<16x128xf32>
    %4 = vector.broadcast %1 : vector<1x128xf32> to vector<16x128xf32>
    %5 = arith.mulf %3, %4 : vector<16x128xf32>
    %6 = vector.broadcast %2 : vector<1x128xf32> to vector<16x128xf32>
    %7 = arith.addf %5, %6 : vector<16x128xf32>
    %cst = arith.constant 0.000000e+00 : f32
    %8 = vector.broadcast %cst : f32 to vector<16x128xf32>
    %9 = arith.maximumf %7, %8 : vector<16x128xf32>
    %c0_5 = arith.constant 0 : index
    %c0_6 = arith.constant 0 : index
    %10 = vector.load %arg4[%c0_5, %c0_6] : memref<16x128xf32, #tpu.memory_space<vmem>>, vector<16x128xf32>
    tpu.vector_store %arg4[%c0_5, %c0_6], %9 {strides = array<i32>} : memref<16x128xf32, #tpu.memory_space<vmem>>, vector<16x128xf32>,
    return
  }
  func.func @transform_0(%arg0: i32) -> (i32, i32) {
    %c0_i32 = arith.constant 0 : i32
    %c0_i32_0 = arith.constant 0 : i32
    return %arg0, %c0_i32 : i32, i32
  }
  func.func @transform_1(%arg0: i32) -> (i32, i32) {
    %c0_i32 = arith.constant 0 : i32
    %c0_i32_0 = arith.constant 0 : i32
    %c0_i32_1 = arith.constant 0 : i32
    return %c0_i32, %c0_i32_0 : i32, i32
  }
  func.func @transform_2(%arg0: i32) -> (i32, i32) {
    %c0_i32 = arith.constant 0 : i32
    %c0_i32_0 = arith.constant 0 : i32
    %c0_i32_1 = arith.constant 0 : i32
    return %c0_i32, %c0_i32_0 : i32, i32
  }
  func.func @transform_3(%arg0: i32) -> (i32, i32) {
    %c0_i32 = arith.constant 0 : i32
    %c0_i32_0 = arith.constant 0 : i32
    return %arg0, %c0_i32 : i32, i32
  }
}

</mosaic_0001>

<bundles_post_ra>
// kernel: _time_encoder_pallas.1
= control target key start
LH: loop header
LB: loop body
LE: loop exit
PB: predicated region body
PF: predicated region fallthrough
CT: control target
= control target key end

     0   :  { %8 = vsyncpa [#allocation3], 0  ;;  %s536_s0 = inlined_call_operand.vmem [shape: f32[32,1], index: 0, kind: input, shape index: {}]   ;;  %s537_s1 = inlined_call_operand.vmem [shape: f32[1,128], index: 1, kind: input, shape index: {}]   ;;  %s538_s2 = inlined_call_operand.vmem [shape: f32[1,128], index: 2, kind: input, shape index: {}]   ;;  %s539_s3 = inlined_call_operand.hbm [shape: f32[32,128], index: 3, kind: output, shape index: {}]  }
   0x1   :  { %10 = vsyncpa [#allocation3 + $0x1], 0  ;;  %s428_s12 = smov 0   ;;  %s430_s13 = smov 0  }
   0x2   :  { %s432_s14 = smov 0   ;;  %s434_s15 = smov 0  }
   0x3 LB: > { %s449_s16 = sadd.s32 4294967295, %s402_s15   ;;  %s282_s17 = sadd.s32 4294967294, %s402_s15   ;;  %s402_s15 = sphi %s434_s15, %s545_s15   ;;  %s398_s14 = sphi %s432_s14, %s544_s14   ;;  %s394_s13 = sphi %s430_s13, %s543_s13   ;;  %s390_s12 = sphi %s428_s12, %s542_s12  }
   0x4   : > { %s453_s18 = sadd.s32 1, %s402_s15   ;;  %s91_s19 = sadd.s32 1, %s398_s14 }
   0x5   : > { %s88_s20 = ssub.s32 %s402_s15, %s453_s18  ;;  %p101_p0 = scmp.ne.s32.totalorder %s398_s14, %s394_s13 }
   0x6   : > { %p89_p1 = scmp.eq.s32.totalorder %s88_s20, 0  ;;  %p102_p2 = scmp.eq.s32.totalorder %s449_s16, 1 }
   0x7   : > { %p107_p3 = scmp.ne.s32.totalorder %s394_s13, %s390_s12  ;;  %p108_p4 = scmp.eq.s32.totalorder %s282_s17, 1 }
   0x8   : > { %s464_s21 = scalar_select %p89_p1, %s398_s14, %s91_s19  }
   0x9   : > { %p466_p5 = por %p102_p2, %p101_p0  ;;  %p470_p6 = por %p108_p4, %p107_p3 }
   0xa   : > { %p285_p7 = scmp.ge.s32.totalorder %s402_s15, 1  ;;  %p141_p8 = scmp.lt.s32.totalorder %s402_s15, 3 }
   0xc   : > { %p142_p9 = pnand %p285_p7, %p141_p8 }
   0xd   : > { %s287_s24 = sshll.u32 (!%p142_p9), %s449_s16, 1  ;;  %v404_v0 = vmov (!%p142_p9), 0   ;;  %v289_v3 = vld [vmem:[%s537_s1] ss:$0 sm:$0xff] (!%p142_p9)  ;;  %s162_s4 = sand.u32 (!%p142_p9), 1, %s394_s13  }
   0xe   : > { %145 = sbr.rel (%p142_p9) target bundleno = 178 (0xb2), region = 32  ;;  %339 = vset.pattern.permute.xlu0 (!%p142_p9), %v404_v0  ;;  %p166_p10 = scmp.lt.s32.totalorder (!%p142_p9), %s287_s24, 3  ;;  %v290_v4 = vld [vmem:[%s538_s2] ss:$0 sm:$0xff] (!%p142_p9) }
   0xf   : > { %s286_s7 = sshll.u32 (!%p142_p9), %s162_s4, 4  ;;  %s296_s10 = sshll.u32 (!%p142_p9), %s449_s16, 8 }
  0x10   : > { %s164_s8 = scalar_lea.vmem (!%p142_p9), [#allocation2], %s286_s7  ;;  %s493_s19 = scalar_lea.hbm (!%p142_p9), %s539_s3, %s296_s10 }
  0x11   : > { %s220_s9 = sshll.u32 (!%p142_p9), %s164_s8, 4  ;;  %s495_s20 = scalar_lea.sflag (!%p142_p9), [#allocation3], %s162_s4  ;;  %s488_s9 = int_to_ptr.vmem [resolvable:$true] %s220_s9 }
  0x12   : > { %s405_s16 = smov (!%p142_p9), [#allocation2]  }
  0x15   : > { %s547_s24 = smov (!%p166_p10, %s287_s24), 3 }
  0x16   : > { %s288_s25 = sshll.u32 %s547_s24, 3  ;;  %s340_s24 = scalar_lea.vmem %s488_s9, 256 }
  0x17   : > { %s169_s28 = scalar_lea.vmem %s536_s0, %s288_s25  ;;  %p341_p11 = scmp.ne.s32.totalorder %s488_s9, %s340_s24 }
  0x18   : > { %v172_v1 = vld [vmem:[%s169_s28] sm:$0xff]  ;;  %v173_v2 = vld [vmem:[%s169_s28 + $0x8] sm:$0xff]  ;;  %s344_s25 = sshll.u32 %s405_s16, 4  ;;  %s345_s25 = int_to_ptr.vmem [resolvable:$false] %s344_s25 }
  0x19   : > { %178 = vperm.xlu0 %339, %v172_v1   ;;  %p342_p12 = pnand %p341_p11, %p466_p5  ;;  %s346_s26 = scalar_lea.vmem %s345_s25, 512 }
  0x1a   : > { %p347_p0 = scmp.lt.s32.totalorder %s488_s9, %s345_s25  ;;  %p348_p1 = scmp.lt.s32.totalorder %s346_s26, %s340_s24 }
  0x1b   : > { %p343_p13 = pneg %p342_p12 }
  0x1c   : > { %p349_p2 = por %p348_p1, %p347_p0 }
  0x1d   : > { %183 = vperm.xlu0 %339, %v173_v2  }
  0x1e   : > { %p350_p3 = pnand %p349_p2, %p343_p13 }
  0x98   : > { %v179_v5 = vpop.permute.xlu0 %178 }
  0x99   : > { %v192_v6 = vmul.f32 %v289_v3, %v179_v5 }
  0x9b   : > { %v200_v7 = vadd.f32 %v290_v4, %v192_v6 }
  0x9c   : > { %v184_v8 = vpop.permute.xlu0 %183 }
  0x9d   : > { %v202_v9 = vmax.f32 %v200_v7, 0.0  ;;  %v193_v10 = vmul.f32 %v289_v3, %v184_v8 }
  0x9f   : > { %204 = vst [vmem:[%s164_s8] sm:$0xff] %v202_v9  ;;  %v201_v11 = vadd.f32 %v290_v4, %v193_v10 }
  0xa1   : > { %v203_v12 = vmax.f32 %v201_v11, 0.0 }
  0xa3   : > { %205 = vst [vmem:[%s164_s8 + $0x8] sm:$0xff] %v203_v12 }
  0xa4   : > { %353 = shalt.err (!%p350_p3)
}
  0xa5   : > { %s354_s27 = scalar_lea.hbm %s493_s19, 256  ;;  %s358_s30 = scalar_lea.hbm %s539_s3, 512 }
  0xa6   : > { %p355_p4 = scmp.ne.s32.totalorder %s493_s19, %s354_s27  ;;  %p359_p9 = scmp.lt.u32.totalorder %s493_s19, %s539_s3 }
  0xa7   : > { %p360_p10 = scmp.lt.u32.totalorder %s358_s30, %s354_s27  ;;  %p362_p12 = scmp.lt.u32.totalorder %s354_s27, %s493_s19 }
  0xa8   : > { %p356_p7 = pnand %p355_p4, %p466_p5 }
  0xa9   : > { %p361_p11 = por %p360_p10, %p359_p9 }
  0xaa   : > { %p357_p8 = pneg %p356_p7 }
  0xab   : > { %p363_p13 = por %p362_p12, %p361_p11 }
  0xad   : > { %p364_p0 = pnand %p363_p13, %p357_p8 }
  0xaf   : > { %367 = shalt.err (!%p364_p0)
}
  0xb0   : > { %s406_s6 = smov 128   ;;  %s407_s7 = smov 8  }
  0xb1   : > { %297 = dma.vmem_to_hbm [thread:$0]  (%p466_p5), %s488_s9, 256, %s493_s19, %s495_s20, %s406_s6, %s406_s6, %s407_s7  }
  0xb2 PF: > { %p303_p1 = scmp.ge.s32.totalorder %s402_s15, 2  ;;  %s235_s8 = sand.u32 1, %s390_s12  }
  0xb3   : > { %s236_s10 = scalar_lea.sflag [#allocation3], %s235_s8 }
  0xb4   : > { %p300_p2 = pnand %p303_p1, %p470_p6 }
  0xb6   : > { %385 = dma.done.wait (!%p300_p2), %s236_s10, 256  }
  0xb7   : > { %387 = vsyncadd (!%p300_p2), %s236_s10, 4294967040  ;;  %p13_p3 = scmp.ge.s32.totalorder %s453_s18, 4   ;;  %s542_s12 = smov %s394_s13 }
  0xb8   : > { %s543_s13 = smov %s398_s14  ;;  %s544_s14 = smov %s464_s21 }
  0xb9   : > { %s545_s15 = smov %s453_s18  ;;  %15 = sbr.rel (!%p13_p3) target bundleno = 3 (0x3), region = 67 }
  0xc0   :  { %241 = vsyncpa [#allocation3], 1 }
  0xc1   :  { %243 = vsyncpa [#allocation3 + $0x1], 1 }

</bundles_post_ra>
